<compile_context>
chip_gen: v6e
topology: v6e:2x2x1
jax: 0.10.0
libtpu: 0.0.40
codegen_flags: <defaults>
</compile_context>

<pallas_src>
import math

import jax
import jax.numpy as jnp
from jax.experimental import pallas as pl
from jax.experimental.pallas import tpu as pltpu


_MIB = 1024 * 1024
_MIN_SPLIT_BYTES = 1 * _MIB  # below this total size a single block is cheapest


def _vmem_capacity_bytes() -> int:
    """Physical VMEM per TensorCore (64 MiB on v7x, 128 MiB on v5e/v6e)."""
    try:
        cap = int(getattr(pltpu.get_tpu_info(), "vmem_capacity_bytes", 0))
        if cap > 0:
            return cap
    except Exception:
        pass
    return 64 * _MIB  # conservative default (v7x-sized)


def _sublane_multiple(dtype) -> int:
    # f32 packs 8 rows per vreg sublane group, bf16 packs 16, int8/fp8 pack 32.
    return max(8, 32 // jnp.dtype(dtype).itemsize)


def _footprint_factor(dtype) -> int:
    """Per-grid-step VMEM footprint as a multiple of one input block.

    2x input buffers + 2x output buffers (BlockSpec double-buffering) + in-kernel f32
    copy of x for the reduction (4/itemsize input blocks) + 1x slack for other temps.
    """
    itemsize = jnp.dtype(dtype).itemsize
    f32_temp = max(1, 4 // itemsize)
    return 2 + 2 + f32_temp + 1  # 6x for f32, 7x for bf16, 9x for 8-bit dtypes


def _choose_tile_rows(rows: int, dim: int, dtype, vmem_budget_bytes: int,
                      target_block_bytes: int) -> int:
    """Pick a row tile from the footprint budget, a per-block target, and grid shape."""
    sub = _sublane_multiple(dtype)
    row_bytes = dim * jnp.dtype(dtype).itemsize

    # Tiny problems: one block covering everything (block dims == array dims is legal);
    # the ~0.35 us per-grid-step overhead dominates any split.
    if rows * row_bytes <= _MIN_SPLIT_BYTES:
        return rows

    factor = _footprint_factor(dtype)
    t_vmem = max(1, int(vmem_budget_bytes) // (factor * row_bytes))
    t_tgt = max(1, int(target_block_bytes) // row_bytes)
    t = min(t_vmem, t_tgt)

    if rows >= 4 * sub:
        # Keep >= 4 grid blocks so both v7x TensorCores get work and the pipeline has
        # depth; never collapse a large input onto a single block.
        t = min(t, rows // 4)

    t = max(sub, (t // sub) * sub)  # dtype-native sublane multiple
    return min(t, rows)


def _vmem_limit_bytes(tile_rows: int, dim: int, dtype, cap: int) -> int:
    """Footprint-derived scoped-VMEM limit with headroom, capped at 75% of physical."""
    row_bytes = dim * jnp.dtype(dtype).itemsize
    footprint = _footprint_factor(dtype) * tile_rows * row_bytes + 2 * dim * 4  # + gamma
    limit = footprint + 16 * _MIB          # headroom for compiler scratch / semaphores
    limit = max(limit, 32 * _MIB)          # never below the usual scoped default
    limit = min(limit, (cap * 3) // 4)     # leave >= 25% of physical VMEM free
    return int(limit)


def _make_rmsnorm_kernel(eps: float, inv_dim: float, low_precision_mul: bool):
    def kernel(x_ref, gamma_ref, o_ref):
        # x_ref: (TILE_ROWS, DIM); gamma_ref: (1, DIM), already float32.
        x = x_ref[...]
        xf = x.astype(jnp.float32)
        ssq = jnp.sum(xf * xf, axis=-1, keepdims=True)       # XLU cross-lane reduce
        inv_rms = jax.lax.rsqrt(ssq * inv_dim + eps)          # EUP rsqrt
        if low_precision_mul:
            # bf16/fp16 I/O: keep the f32 reduction but skip the full-width f32 product;
            # fold gamma into the per-row scale, cast once, multiply on the bf16 VALU.
            o_ref[...] = (x * (inv_rms * gamma_ref[...]).astype(o_ref.dtype)).astype(
                o_ref.dtype)
        else:
            o_ref[...] = (xf * inv_rms * gamma_ref[...]).astype(o_ref.dtype)
    return kernel


def rmsnorm(x: jnp.ndarray, gamma: jnp.ndarray, eps: float = 1e-6,
            tile_rows: int | None = None) -> jnp.ndarray:
    """RMSNorm over the last axis. x: [..., dim], gamma: [dim]."""
    orig_shape = x.shape
    dim = orig_shape[-1]
    assert gamma.shape == (dim,)

    rows = int(math.prod(orig_shape[:-1])) if len(orig_shape) > 1 else 1
    x2d = x.reshape(rows, dim)

    # Pre-cast gamma once; the reduction runs in f32 regardless of the input dtype.
    gamma2d = gamma.astype(jnp.float32).reshape(1, dim)

    cap = _vmem_capacity_bytes()
    vmem_budget = min(cap - 16 * _MIB, (cap * 3) // 5)           # footprint budget
    target_block = 12 * _MIB if cap >= 128 * _MIB else 6 * _MIB  # per-block target

    sub = _sublane_multiple(x.dtype)
    if tile_rows is None:
        tile_rows = _choose_tile_rows(rows, dim, x.dtype, vmem_budget, target_block)
    else:
        tile_rows = max(1, min(int(tile_rows), rows))
        if tile_rows < rows:  # keep user-supplied tiles layout-legal
            tile_rows = max(sub, (tile_rows // sub) * sub)
            tile_rows = min(tile_rows, rows)

    grid = (pl.cdiv(rows, tile_rows),)

    low_precision_mul = (jnp.issubdtype(x.dtype, jnp.floating)
                         and jnp.dtype(x.dtype).itemsize < 4)

    # NOTE: for production LLM dims (dim % 128 == 0) the output is lane-dense; for very
    # small dims the stores are masked (perf only, still correct).
    out = pl.pallas_call(
        _make_rmsnorm_kernel(float(eps), 1.0 / float(dim), low_precision_mul),
        out_shape=jax.ShapeDtypeStruct((rows, dim), x.dtype),
        grid_spec=pltpu.PrefetchScalarGridSpec(
            num_scalar_prefetch=0,
            grid=grid,
            in_specs=[
                pl.BlockSpec((tile_rows, dim), lambda i: (i, 0)),
                pl.BlockSpec((1, dim), lambda i: (0, 0)),
            ],
            out_specs=pl.BlockSpec((tile_rows, dim), lambda i: (i, 0)),
        ),
        compiler_params=pltpu.CompilerParams(
            dimension_semantics=("parallel",),
            vmem_limit_bytes=_vmem_limit_bytes(tile_rows, dim, x.dtype, cap),
        ),
    )(x2d, gamma2d)

    return out.reshape(orig_shape)


def _rmsnorm_ref(x, gamma, eps=1e-6):
    xf = x.astype(jnp.float32)
    rms = jnp.sqrt(jnp.mean(xf * xf, axis=-1, keepdims=True) + eps)
    return (gamma * (xf / rms)).astype(x.dtype)


if __name__ == "__main__":
    key = jax.random.PRNGKey(0)
    batch, seq, dim = 2, 8, 32

    k1, k2, k3 = jax.random.split(key, 3)
    x3d = jax.random.normal(k1, (batch, seq, dim), dtype=jnp.float32)
    x2d = jax.random.normal(k2, (batch, dim), dtype=jnp.float32)
    xbf = jax.random.normal(k3, (batch, seq, dim), dtype=jnp.float32).astype(jnp.bfloat16)

    # Deterministic parameter init (matches nn.Parameter(torch.ones(dim))).
    gamma = jnp.ones((dim,), dtype=jnp.float32)

    out3d = jax.block_until_ready(rmsnorm(x3d, gamma))
    out2d = jax.block_until_ready(rmsnorm(x2d, gamma))
    outbf = jax.block_until_ready(rmsnorm(xbf, gamma))

    ref3d = _rmsnorm_ref(x3d, gamma)
    ref2d = _rmsnorm_ref(x2d, gamma)
    refbf = _rmsnorm_ref(xbf, gamma)

    assert out3d.shape == x3d.shape and out2d.shape == x2d.shape and outbf.shape == xbf.shape
    assert jnp.allclose(out3d, ref3d, atol=1e-5, rtol=1e-5)
    assert jnp.allclose(out2d, ref2d, atol=1e-5, rtol=1e-5)
    assert jnp.allclose(outbf.astype(jnp.float32), refbf.astype(jnp.float32),
                        atol=2e-2, rtol=2e-2)

    print("KERNEL_OK")
</pallas_src>

<mosaic_0001>
module attributes {stable_mosaic.version = 11 : i64} {
  func.func @kernel(%arg0: i32, %arg1: memref<16x32xf32, #tpu.memory_space<vmem>>, %arg2: memref<1x32xf32, #tpu.memory_space<vmem>>, %arg3: memref<16x32xf32, #tpu.memory_space<vmem>>) attributes {dimension_semantics = [#tpu.dimension_semantics<parallel>], iteration_bounds = array<i64: 1>, scalar_prefetch = 0 : i64, scratch_operands = 0 : i64, tpu.core_type = #tpu.core_type<tc>, window_params = [{transform_indices = @transform_0, window_bounds = array<i64: 16, 32>}, {pipeline_mode = #tpu.pipeline_mode<synchronous>, transform_indices = @transform_1, window_bounds = array<i64: 1, 32>}, {transform_indices = @transform_2, window_bounds = array<i64: 16, 32>}]} {
    %c0 = arith.constant 0 : index
    %c0_0 = arith.constant 0 : index
    %0 = vector.load %arg1[%c0, %c0_0] : memref<16x32xf32, #tpu.memory_space<vmem>>, vector<16x32xf32>
    %1 = arith.mulf %0, %0 : vector<16x32xf32>
    %cst = arith.constant dense<0.000000e+00> : vector<16xf32>
    %2 = vector.multi_reduction <add>, %1, %cst [1] : vector<16x32xf32> to vector<16xf32>
    %3 = vector.shape_cast %2 : vector<16xf32> to vector<16x1xf32>
    %cst_1 = arith.constant 3.125000e-02 : f32
    %4 = vector.broadcast %cst_1 : f32 to vector<16x1xf32>
    %5 = arith.mulf %3, %4 : vector<16x1xf32>
    %cst_2 = arith.constant 9.99999997E-7 : f32
    %6 = vector.broadcast %cst_2 : f32 to vector<16x1xf32>
    %7 = arith.addf %5, %6 : vector<16x1xf32>
    %8 = math.rsqrt %7 : vector<16x1xf32>
    %9 = vector.broadcast %8 : vector<16x1xf32> to vector<16x32xf32>
    %10 = arith.mulf %0, %9 : vector<16x32xf32>
    %c0_3 = arith.constant 0 : index
    %c0_4 = arith.constant 0 : index
    %11 = vector.load %arg2[%c0_3, %c0_4] : memref<1x32xf32, #tpu.memory_space<vmem>>, vector<1x32xf32>
    %12 = vector.broadcast %11 : vector<1x32xf32> to vector<16x32xf32>
    %13 = arith.mulf %10, %12 : vector<16x32xf32>
    %c0_5 = arith.constant 0 : index
    %c0_6 = arith.constant 0 : index
    %14 = vector.load %arg3[%c0_5, %c0_6] : memref<16x32xf32, #tpu.memory_space<vmem>>, vector<16x32xf32>
    tpu.vector_store %arg3[%c0_5, %c0_6], %13 {strides = array<i32>} : memref<16x32xf32, #tpu.memory_space<vmem>>, vector<16x32xf32>,
    return
  }
  func.func @transform_0(%arg0: i32) -> (i32, i32) {
    %c0_i32 = arith.constant 0 : i32
    %c0_i32_0 = arith.constant 0 : i32
    return %arg0, %c0_i32 : i32, i32
  }
  func.func @transform_1(%arg0: i32) -> (i32, i32) {
    %c0_i32 = arith.constant 0 : i32
    %c0_i32_0 = arith.constant 0 : i32
    %c0_i32_1 = arith.constant 0 : i32
    return %c0_i32, %c0_i32_0 : i32, i32
  }
  func.func @transform_2(%arg0: i32) -> (i32, i32) {
    %c0_i32 = arith.constant 0 : i32
    %c0_i32_0 = arith.constant 0 : i32
    return %arg0, %c0_i32 : i32, i32
  }
}

</mosaic_0001>

<bundles_post_ra>
// kernel: tpu_custom_call.1
= control target key start
LH: loop header
LB: loop body
LE: loop exit
PB: predicated region body
PF: predicated region fallthrough
CT: control target
= control target key end

     0   :  { %7 = vsyncpa [#allocation3], 0  ;;  %s164_s0 = inlined_call_operand.hbm [shape: f32[16,32], index: 0, kind: input, shape index: {}]   ;;  %s165_s1 = inlined_call_operand.vmem [shape: f32[1,32], index: 1, kind: input, shape index: {}]   ;;  %s166_s2 = inlined_call_operand.hbm [shape: f32[16,32], index: 2, kind: output, shape index: {}]  }
   0x1   :  { %8 = vsyncpa [#allocation4], 0  ;;  %s126_s9 = smov [#allocation2]  }
   0x2   :  { %s14_s10 = sshll.u32 %s126_s9, 4  ;;  %s15_s10 = int_to_ptr.vmem [resolvable:$true] %s14_s10 }
   0x3   :  { %s90_s11 = scalar_lea.vmem %s15_s10, 256  ;;  %p95_p1 = scmp.lt.s32.totalorder %s15_s10, %s15_s10 }
   0x4   :  { %p91_p0 = scmp.ne.s32.totalorder %s15_s10, %s90_s11  ;;  %p96_p2 = scmp.lt.s32.totalorder %s90_s11, %s90_s11 }
   0x6   :  { %p97_p3 = por %p96_p2, %p95_p1 }
   0x8   :  { %p98_p4 = pnand %p97_p3, %p91_p0 }
   0xa   :  { %101 = shalt.err (!%p98_p4)
}
   0xb   :  { %s127_s12 = smov 128   ;;  %s128_s13 = smov 8  }
   0xc   :  { %20 = dma.hbm_to_vmem [thread:$0]  %s164_s0, 256, %s15_s10, [#allocation3], %s127_s12, %s127_s12, %s128_s13  }
   0xd   :  { %122 = dma.done.wait [#allocation3], 256  }
   0xe   :  { %123 = vsyncadd [#allocation3], 4294967040  ;;  %v26_v0 = vld [vmem:[#allocation2] sm:$0xff]  ;;  %vm30_vm0 = vcmask 261120   ;;  %v27_v1 = vld [vmem:[#allocation2 + $0x8] sm:$0xff]  ;;  %s129_s17 = smov [#allocation5]  }
   0xf   :  { %v28_v2 = vmul.f32 %v26_v0, %v26_v0  ;;  %v29_v3 = vmul.f32 %v27_v1, %v27_v1  ;;  %v73_v13 = vld [vmem:[%s165_s1] ss:$0 sm:$0xff]  ;;  %s61_s18 = sshll.u32 %s129_s17, 4  ;;  %s62_s18 = int_to_ptr.vmem [resolvable:$true] %s61_s18 }
  0x10   :  { %s102_s19 = scalar_lea.vmem %s62_s18, 256  ;;  %p107_p6 = scmp.lt.s32.totalorder %s62_s18, %s62_s18 }
  0x11   :  { %v31_v4 = vsel %vm30_vm0, %v28_v2, 0.0  ;;  %v34_v5 = vsel %vm30_vm0, %v29_v3, 0.0  ;;  %p103_p5 = scmp.ne.s32.totalorder %s62_s18, %s102_s19  ;;  %p108_p7 = scmp.lt.s32.totalorder %s102_s19, %s102_s19 }
  0x12   :  { %32 = vadd.xlane.f32.xlu0 %v31_v4 }
  0x13   :  { %p109_p8 = por %p108_p7, %p107_p6 }
  0x15   :  { %p110_p9 = pnand %p109_p8, %p103_p5 }
  0x16   :  { %35 = vadd.xlane.f32.xlu0 %v34_v5 }
  0x9b   :  { %v33_v6 = vpop.xlane.xlu0 %32 }
  0x9c   :  { %v37_v7 = vmul.f32 0.03125, %v33_v6 }
  0x9e   :  { %v39_v8 = vadd.f32 1e-06, %v37_v7 }
  0x9f   :  { %v36_v9 = vpop.xlane.xlu0 %35 }
  0xa0   :  { %78 = vrsqrt.f32 %v39_v8  ;;  %v38_v10 = vmul.f32 0.03125, %v36_v9 }
  0xa2   :  { %v40_v11 = vadd.f32 1e-06, %v38_v10 }
  0xa4   :  { %80 = vrsqrt.f32 %v40_v11 }
  0xad   :  { %v79_v12 = vpop.eup %78 }
  0xae   :  { %v43_v14 = vmul.f32 %v79_v12, %v26_v0 }
  0xb0   :  { %v52_v15 = vmul.f32 %v73_v13, %v43_v14 }
  0xb1   :  { %v81_v16 = vpop.eup %80 }
  0xb2   :  { %v44_v17 = vmul.f32 %v81_v16, %v27_v1  ;;  %54 = vst.msk [vmem:[#allocation5] sm:$0xff] %vm30_vm0, %v52_v15 }
  0xb4   :  { %v53_v18 = vmul.f32 %v73_v13, %v44_v17 }
  0xb6   :  { %55 = vst.msk [vmem:[#allocation5 + $0x8] sm:$0xff] %vm30_vm0, %v53_v18 }
  0xb7   :  { %113 = shalt.err (!%p110_p9)
}
  0xb8   :  { %67 = dma.vmem_to_hbm [thread:$0]  %s62_s18, 256, %s166_s2, [#allocation4], %s127_s12, %s127_s12, %s128_s13  }
  0xb9   :  { %124 = dma.done.wait [#allocation4], 256  }
  0xba   :  { %125 = vsyncadd [#allocation4], 4294967040 }
  0xbb   :  { %71 = vsyncpa [#allocation3], 1 }
  0xbc   :  { %72 = vsyncpa [#allocation4], 1 }

</bundles_post_ra>
